<compile_context>
chip_gen: v5e
topology: v5e:2x2
jax: 0.10.0
libtpu: 0.0.40
codegen_flags: <defaults>
</compile_context>

<pallas_src>
import jax
import jax.numpy as jnp
from jax.experimental import pallas as pl
from jax.experimental.pallas import tpu as pltpu


def _round_up(x, m):
    return ((x + m - 1) // m) * m


def _mlp_kernel(*refs):
    """refs = (x, w1, b1, [w_hidden, b_hidden] * n_hidden, w_out_T, b_out, out_t)."""
    x_ref = refs[0]          # (blk, n_inputs)  -- batch on sublanes (input layout)
    out_ref = refs[-1]       # (n_outputs, blk) -- batch on lanes (lane-dense store)
    p = refs[1:-1]
    n_hidden = len(p) // 2 - 2
    n_outputs = out_ref.shape[0]

    x = x_ref[...]           # (blk, n_inputs) f32
    w1 = p[0][...]           # (n_nodes, n_inputs) f32
    b1 = p[1][...]           # (n_nodes, 1) f32

    # fc1 on the MXU: contract the tiny K = n_inputs axis of both operands
    # (w1 [M,K] x x [N,K] -> [M,N], same dimension numbers as q.k^T in flash
    # attention).  Result is (n_nodes, blk), i.e. the activation lands directly
    # in the lane-dense batch-on-lanes layout with no wrapper transpose.
    h = jax.lax.dot_general(w1, x, (((1,), (1,)), ((), ())),
                            preferred_element_type=jnp.float32)
    h = jnp.maximum(h + b1, 0.0)                               # (n_nodes, blk) f32

    # Hidden nNodes x nNodes layers: well-shaped MXU matmuls with f32
    # accumulation.  Activations are carried in the hidden weights' dtype
    # (bf16 when use_bf16=True) so the (n_nodes, blk) intermediate costs half
    # the vreg / VMEM traffic between layers.
    act_dtype = p[2].dtype if n_hidden > 0 else jnp.float32
    h = h.astype(act_dtype)
    for i in range(n_hidden):
        w = p[2 + 2 * i][...]                                  # (n_nodes, n_nodes)
        b = p[3 + 2 * i][...]                                  # (n_nodes, 1) f32
        z = jnp.dot(w, h, preferred_element_type=jnp.float32)  # f32 accumulate
        h = jnp.maximum(z + b, 0.0).astype(act_dtype)          # fused bias+ReLU(+cast)

    w_out = p[-2][...]        # (n_nodes, n_outputs) f32
    b_out = p[-1][...]        # (n_outputs, 1) f32
    if n_outputs == 1:
        # N = 1 is degenerate for the MXU: VPU multiply + sublane (XLU) reduce.
        y = jnp.sum(w_out * h, axis=0, keepdims=True)          # promotes to f32
    else:
        y = jax.lax.dot_general(w_out, h.astype(jnp.float32),
                                (((0,), (0,)), ((), ())),
                                preferred_element_type=jnp.float32)
    out_ref[...] = (y + b_out).astype(out_ref.dtype)


def init_value_model_params(key, n_inputs=4, n_outputs=1, n_layer=1, n_nodes=64):
    """PyTorch-layout params: W[i] is [fan_out, fan_in], b[i] is [fan_out]."""
    params = []
    dims = [(n_inputs, n_nodes)] + [(n_nodes, n_nodes)] * n_layer + [(n_nodes, n_outputs)]
    for fan_in, fan_out in dims:
        key, kw, kb = jax.random.split(key, 3)
        bound = float(fan_in) ** -0.5
        params.append(jax.random.uniform(kw, (fan_out, fan_in), jnp.float32, -bound, bound))
        params.append(jax.random.uniform(kb, (fan_out,), jnp.float32, -bound, bound))
    return params


def value_model_forward(x, params, *, block_batch=16384, use_bf16=True):
    """x: [B, n_inputs] f32; params in PyTorch layout. Returns [B, n_outputs] f32.

    On v5e (no bf16 VALU) prefer use_bf16=False.
    """
    batch, n_inputs = x.shape
    ws, bs = params[0::2], params[1::2]
    n_nodes = ws[0].shape[0]
    n_outputs = ws[-1].shape[0]
    n_hidden = len(ws) - 2

    # Batch tile (lane axis): multiple of 128, large enough to amortize the
    # ~0.35us per-grid-step overhead, capped at ~batch/2 so the "parallel" axis
    # keeps >= 2 steps whenever possible (v7x megacore sharding).
    blk = min(block_batch, _round_up(pl.cdiv(batch, 2), 128))
    blk = _round_up(max(blk, 128), 128)
    grid = (pl.cdiv(batch, blk),)

    mm_dtype = jnp.bfloat16 if use_bf16 else jnp.float32
    kparams = [ws[0].astype(jnp.float32),                         # fc1 weight, f32
               bs[0].reshape(n_nodes, 1).astype(jnp.float32)]
    for i in range(n_hidden):
        kparams.append(ws[1 + i].astype(mm_dtype))                # (n_nodes, n_nodes)
        kparams.append(bs[1 + i].reshape(n_nodes, 1).astype(jnp.float32))
    kparams.append(ws[-1].T.astype(jnp.float32))                  # (n_nodes, n_outputs)
    kparams.append(bs[-1].reshape(n_outputs, 1).astype(jnp.float32))

    in_specs = [pl.BlockSpec((blk, n_inputs), lambda i: (i, 0))]
    for arr in kparams:                                           # VMEM-resident weights
        in_specs.append(pl.BlockSpec(arr.shape, lambda i: (0, 0)))

    param_bytes = sum(int(a.size) * a.dtype.itemsize for a in kparams)
    cost = pl.CostEstimate(
        flops=2 * batch * (n_inputs * n_nodes
                           + n_hidden * n_nodes * n_nodes
                           + n_nodes * n_outputs),
        transcendentals=0,
        bytes_accessed=4 * batch * (n_inputs + n_outputs) + grid[0] * param_bytes,
    )

    out_t = pl.pallas_call(
        _mlp_kernel,
        out_shape=jax.ShapeDtypeStruct((n_outputs, batch), jnp.float32),
        grid_spec=pltpu.PrefetchScalarGridSpec(
            num_scalar_prefetch=0,
            grid=grid,
            in_specs=in_specs,
            out_specs=pl.BlockSpec((n_outputs, blk), lambda i: (0, i)),
        ),
        compiler_params=pltpu.CompilerParams(
            dimension_semantics=("parallel",),       # megacore sharding on v7x
            vmem_limit_bytes=48 * 1024 * 1024,       # < v7x's 64 MiB physical VMEM
        ),
        cost_estimate=cost,
    )(x.astype(jnp.float32), *kparams)

    return out_t.T


def value_model_ref(x, params):
    """Pure-JAX f32 reference of the PyTorch forward pass."""
    ws, bs = params[0::2], params[1::2]
    h = jnp.maximum(x @ ws[0].T + bs[0], 0.0)
    for w, b in zip(ws[1:-1], bs[1:-1]):
        h = jnp.maximum(h @ w.T + b, 0.0)
    return h @ ws[-1].T + bs[-1]


if __name__ == "__main__":
    N_INPUTS, N_OUTPUTS, N_LAYER, N_NODES = 4, 1, 1, 64
    BATCH = 8

    key = jax.random.PRNGKey(0)
    key, kx, kx2 = jax.random.split(key, 3)
    x = jax.random.normal(kx, (BATCH, N_INPUTS), dtype=jnp.float32)
    params = init_value_model_params(key, N_INPUTS, N_OUTPUTS, N_LAYER, N_NODES)

    ref = value_model_ref(x, params)

    # f32 weights/activations (tolerance covers default-vs-full matmul precision).
    out_f32 = jax.block_until_ready(value_model_forward(x, params, use_bf16=False))
    assert out_f32.shape == (BATCH, N_OUTPUTS), out_f32.shape
    assert jnp.allclose(out_f32, ref, atol=1e-2, rtol=1e-2), \
        float(jnp.max(jnp.abs(out_f32 - ref)))

    # bf16 hidden-layer weights + activations (MXU-native): looser tolerance.
    out_bf16 = jax.block_until_ready(value_model_forward(x, params, use_bf16=True))
    assert out_bf16.shape == (BATCH, N_OUTPUTS), out_bf16.shape
    assert jnp.allclose(out_bf16, ref, atol=5e-2, rtol=5e-2), \
        float(jnp.max(jnp.abs(out_bf16 - ref)))

    # Multi-tile grid with a non-divisible edge block (exercises writeback clip).
    BATCH2 = 200
    x2 = jax.random.normal(kx2, (BATCH2, N_INPUTS), dtype=jnp.float32)
    ref2 = value_model_ref(x2, params)
    out2 = jax.block_until_ready(
        value_model_forward(x2, params, block_batch=128, use_bf16=False))
    assert out2.shape == (BATCH2, N_OUTPUTS), out2.shape
    assert jnp.allclose(out2, ref2, atol=1e-2, rtol=1e-2), \
        float(jnp.max(jnp.abs(out2 - ref2)))

    print("KERNEL_OK")
</pallas_src>

<mosaic_0001>
module attributes {stable_mosaic.version = 11 : i64} {
  func.func @_mlp_kernel(%arg0: i32, %arg1: memref<128x4xf32, #tpu.memory_space<vmem>>, %arg2: memref<64x4xf32, #tpu.memory_space<vmem>>, %arg3: memref<64x1xf32, #tpu.memory_space<vmem>>, %arg4: memref<64x64xf32, #tpu.memory_space<vmem>>, %arg5: memref<64x1xf32, #tpu.memory_space<vmem>>, %arg6: memref<64x1xf32, #tpu.memory_space<vmem>>, %arg7: memref<1x1xf32, #tpu.memory_space<vmem>>, %arg8: memref<1x128xf32, #tpu.memory_space<vmem>>) attributes {dimension_semantics = [#tpu.dimension_semantics<parallel>], iteration_bounds = array<i64: 1>, scalar_prefetch = 0 : i64, scratch_operands = 0 : i64, tpu.core_type = #tpu.core_type<tc>, window_params = [{transform_indices = @transform_0, window_bounds = array<i64: 128, 4>}, {pipeline_mode = #tpu.pipeline_mode<synchronous>, transform_indices = @transform_1, window_bounds = array<i64: 64, 4>}, {pipeline_mode = #tpu.pipeline_mode<synchronous>, transform_indices = @transform_2, window_bounds = array<i64: 64, 1>}, {pipeline_mode = #tpu.pipeline_mode<synchronous>, transform_indices = @transform_3, window_bounds = array<i64: 64, 64>}, {pipeline_mode = #tpu.pipeline_mode<synchronous>, transform_indices = @transform_4, window_bounds = array<i64: 64, 1>}, {pipeline_mode = #tpu.pipeline_mode<synchronous>, transform_indices = @transform_5, window_bounds = array<i64: 64, 1>}, {pipeline_mode = #tpu.pipeline_mode<synchronous>, transform_indices = @transform_6, window_bounds = array<i64: 1, 1>}, {transform_indices = @transform_7, window_bounds = array<i64: 1, 128>}]} {
    %c0 = arith.constant 0 : index
    %c0_0 = arith.constant 0 : index
    %0 = vector.load %arg1[%c0, %c0_0] : memref<128x4xf32, #tpu.memory_space<vmem>>, vector<128x4xf32>
    %c0_1 = arith.constant 0 : index
    %c0_2 = arith.constant 0 : index
    %1 = vector.load %arg2[%c0_1, %c0_2] : memref<64x4xf32, #tpu.memory_space<vmem>>, vector<64x4xf32>
    %c0_3 = arith.constant 0 : index
    %c0_4 = arith.constant 0 : index
    %2 = vector.load %arg3[%c0_3, %c0_4] : memref<64x1xf32, #tpu.memory_space<vmem>>, vector<64x1xf32>
    %cst = arith.constant dense<0.000000e+00> : vector<64x128xf32>
    %3 = tpu.matmul %1, %0, %cst {dimension_numbers = #tpu.dot_dimension_numbers<[1], [1], [0], [0], [0, 0, 1, 0], [], []>} : vector<64x4xf32>, vector<128x4xf32>, vector<64x128xf32> -> vector<64x128xf32>
    %4 = vector.broadcast %2 : vector<64x1xf32> to vector<64x128xf32>
    %5 = arith.addf %3, %4 : vector<64x128xf32>
    %cst_5 = arith.constant 0.000000e+00 : f32
    %6 = vector.broadcast %cst_5 : f32 to vector<64x128xf32>
    %7 = arith.maximumf %5, %6 : vector<64x128xf32>
    %c0_6 = arith.constant 0 : index
    %c0_7 = arith.constant 0 : index
    %8 = vector.load %arg4[%c0_6, %c0_7] : memref<64x64xf32, #tpu.memory_space<vmem>>, vector<64x64xf32>
    %c0_8 = arith.constant 0 : index
    %c0_9 = arith.constant 0 : index
    %9 = vector.load %arg5[%c0_8, %c0_9] : memref<64x1xf32, #tpu.memory_space<vmem>>, vector<64x1xf32>
    %cst_10 = arith.constant dense<0.000000e+00> : vector<64x128xf32>
    %10 = tpu.matmul %8, %7, %cst_10 {dimension_numbers = #tpu.dot_dimension_numbers<[1], [0], [0], [1], [0, 0, 1, 1], [], []>} : vector<64x64xf32>, vector<64x128xf32>, vector<64x128xf32> -> vector<64x128xf32>
    %11 = vector.broadcast %9 : vector<64x1xf32> to vector<64x128xf32>
    %12 = arith.addf %10, %11 : vector<64x128xf32>
    %cst_11 = arith.constant 0.000000e+00 : f32
    %13 = vector.broadcast %cst_11 : f32 to vector<64x128xf32>
    %14 = arith.maximumf %12, %13 : vector<64x128xf32>
    %c0_12 = arith.constant 0 : index
    %c0_13 = arith.constant 0 : index
    %15 = vector.load %arg6[%c0_12, %c0_13] : memref<64x1xf32, #tpu.memory_space<vmem>>, vector<64x1xf32>
    %c0_14 = arith.constant 0 : index
    %c0_15 = arith.constant 0 : index
    %16 = vector.load %arg7[%c0_14, %c0_15] : memref<1x1xf32, #tpu.memory_space<vmem>>, vector<1x1xf32>
    %17 = vector.broadcast %15 : vector<64x1xf32> to vector<64x128xf32>
    %18 = arith.mulf %17, %14 : vector<64x128xf32>
    %cst_16 = arith.constant dense<0.000000e+00> : vector<128xf32>
    %19 = vector.multi_reduction <add>, %18, %cst_16 [0] : vector<64x128xf32> to vector<128xf32>
    %20 = vector.shape_cast %19 : vector<128xf32> to vector<1x128xf32>
    %21 = vector.broadcast %16 : vector<1x1xf32> to vector<1x128xf32>
    %22 = arith.addf %20, %21 : vector<1x128xf32>
    %c0_17 = arith.constant 0 : index
    %c0_18 = arith.constant 0 : index
    %23 = vector.load %arg8[%c0_17, %c0_18] : memref<1x128xf32, #tpu.memory_space<vmem>>, vector<1x128xf32>
    tpu.vector_store %arg8[%c0_17, %c0_18], %22 {strides = array<i32>} : memref<1x128xf32, #tpu.memory_space<vmem>>, vector<1x128xf32>,
    return
  }
  func.func @transform_0(%arg0: i32) -> (i32, i32) {
    %c0_i32 = arith.constant 0 : i32
    %c0_i32_0 = arith.constant 0 : i32
    return %arg0, %c0_i32 : i32, i32
  }
  func.func @transform_1(%arg0: i32) -> (i32, i32) {
    %c0_i32 = arith.constant 0 : i32
    %c0_i32_0 = arith.constant 0 : i32
    %c0_i32_1 = arith.constant 0 : i32
    return %c0_i32, %c0_i32_0 : i32, i32
  }
  func.func @transform_2(%arg0: i32) -> (i32, i32) {
    %c0_i32 = arith.constant 0 : i32
    %c0_i32_0 = arith.constant 0 : i32
    %c0_i32_1 = arith.constant 0 : i32
    return %c0_i32, %c0_i32_0 : i32, i32
  }
  func.func @transform_3(%arg0: i32) -> (i32, i32) {
    %c0_i32 = arith.constant 0 : i32
    %c0_i32_0 = arith.constant 0 : i32
    %c0_i32_1 = arith.constant 0 : i32
    return %c0_i32, %c0_i32_0 : i32, i32
  }
  func.func @transform_4(%arg0: i32) -> (i32, i32) {
    %c0_i32 = arith.constant 0 : i32
    %c0_i32_0 = arith.constant 0 : i32
    %c0_i32_1 = arith.constant 0 : i32
    return %c0_i32, %c0_i32_0 : i32, i32
  }
  func.func @transform_5(%arg0: i32) -> (i32, i32) {
    %c0_i32 = arith.constant 0 : i32
    %c0_i32_0 = arith.constant 0 : i32
    %c0_i32_1 = arith.constant 0 : i32
    return %c0_i32, %c0_i32_0 : i32, i32
  }
  func.func @transform_6(%arg0: i32) -> (i32, i32) {
    %c0_i32 = arith.constant 0 : i32
    %c0_i32_0 = arith.constant 0 : i32
    %c0_i32_1 = arith.constant 0 : i32
    return %c0_i32, %c0_i32_0 : i32, i32
  }
  func.func @transform_7(%arg0: i32) -> (i32, i32) {
    %c0_i32 = arith.constant 0 : i32
    %c0_i32_0 = arith.constant 0 : i32
    return %c0_i32, %arg0 : i32, i32
  }
}

</mosaic_0001>

<bundles_post_ra>
// kernel: tpu_custom_call.1
= control target key start
LH: loop header
LB: loop body
LE: loop exit
PB: predicated region body
PF: predicated region fallthrough
CT: control target
= control target key end

     0   :  { %s822_s0 = inlined_call_operand.vmem [shape: f32[8,4], index: 0, kind: input, shape index: {}]   ;;  %s823_s1 = inlined_call_operand.vmem [shape: f32[64,4], index: 1, kind: input, shape index: {}]   ;;  %s824_s2 = inlined_call_operand.vmem [shape: f32[64,1], index: 2, kind: input, shape index: {}]   ;;  %s825_s3 = inlined_call_operand.vmem [shape: f32[64,64], index: 3, kind: input, shape index: {}]   ;;  %s826_s4 = inlined_call_operand.vmem [shape: f32[64,1], index: 4, kind: input, shape index: {}]   ;;  %s827_s5 = inlined_call_operand.vmem [shape: f32[64,1], index: 5, kind: input, shape index: {}]   ;;  %s828_s6 = inlined_call_operand.<no memory space> [shape: f32[1,1], index: 6, kind: input, shape index: {}]   ;;  %s829_s7 = inlined_call_operand.hbm [shape: f32[1,8], index: 7, kind: output, shape index: {}]  }
   0x1   :  { %v12_v0 = vstv %s828_s6 }
   0x2   :  { %13 = vst [vmem:[#allocation2] sm:$0x1] %v12_v0 }
   0x3   :  { %v44_v1 = vld [vmem:[%s822_s0 + $0x78] sm:$0xff]  ;;  %vm101_vm0 = vcmask 31744   ;;  %v43_v2 = vld [vmem:[%s822_s0 + $0x70] sm:$0xff]  ;;  %v542_v3 = vmov 0  }
   0x4   :  { %479 = vmatpush.xpose.msk.msra.mxu2 %vm101_vm0, %v44_v1  ;;  %480 = vmatpush.xpose.msk.msra.mxu3 %vm101_vm0, %v44_v1  ;;  %v60_v4 = vld [vmem:[%s824_s2 + $0x38] sm:$0xff] }
   0x5   :  { %447 = vmatpush.xpose.msk.msra.mxu0 %vm101_vm0, %v44_v1  ;;  %513 = vset.pattern.permute.xlu0 %v542_v3 }
   0x6   :  { %98 = vperm.xlu0 %513, %v60_v4   ;;  %514 = vset.pattern.permute.xlu1 %v542_v3 }
   0x7   :  { %515 = vset.pattern.permute.xlu2 %v542_v3 }
   0x8   :  { %14 = vsyncpa [#allocation4], 0  ;;  %481 = vmatpush.xpose.msk.msra.mxu2 %vm101_vm0, %v43_v2  ;;  %482 = vmatpush.xpose.msk.msra.mxu3 %vm101_vm0, %v43_v2  ;;  %v58_v5 = vld [vmem:[%s824_s2 + $0x28] sm:$0xff]  ;;  %v59_v7 = vld [vmem:[%s824_s2 + $0x30] sm:$0xff]  ;;  %vm279_vm1 = vcmask 523264   ;;  %s438_s13 = sshll.u32 %s829_s7, 4  ;;  %s439_s13 = int_to_ptr.hbm [resolvable:$true] %s438_s13 }
   0x9   :  { %v42_v6 = vld [vmem:[%s822_s0 + $0x68] sm:$0xff]  ;;  %448 = vmatpush.xpose.msk.msra.mxu0 %vm101_vm0, %v43_v2  ;;  %88 = vperm.xlu1 %514, %v58_v5   ;;  %v41_v8 = vld [vmem:[%s822_s0 + $0x60] sm:$0xff]  ;;  %v40_v10 = vld [vmem:[%s822_s0 + $0x58] sm:$0xff] }
   0xa   :  { %v57_v9 = vld [vmem:[%s824_s2 + $0x20] sm:$0xff]  ;;  %v54_v11 = vld [vmem:[%s824_s2 + $0x8] sm:$0xff]  ;;  %v39_v12 = vld [vmem:[%s822_s0 + $0x50] sm:$0xff] }
   0xb   :  { %v53_v13 = vld [vmem:[%s824_s2] sm:$0xff]  ;;  %v38_v14 = vld [vmem:[%s822_s0 + $0x48] sm:$0xff]  ;;  %v233_v17 = vld [vmem:[%s826_s4 + $0x10] sm:$0xff] }
   0xc   :  { %483 = vmatpush.xpose.msk.msra.mxu2 %vm101_vm0, %v42_v6  ;;  %484 = vmatpush.xpose.msk.msra.mxu3 %vm101_vm0, %v42_v6  ;;  %v232_v15 = vld [vmem:[%s826_s4 + $0x8] sm:$0xff]  ;;  %v37_v16 = vld [vmem:[%s822_s0 + $0x40] sm:$0xff]  ;;  %v36_v18 = vld [vmem:[%s822_s0 + $0x38] sm:$0xff] }
   0xd   :  { %449 = vmatpush.xpose.msk.msra.mxu0 %vm101_vm0, %v42_v6  ;;  %v235_v19 = vld [vmem:[%s826_s4 + $0x20] sm:$0xff]  ;;  %v56_v20 = vld [vmem:[%s824_s2 + $0x18] sm:$0xff]  ;;  %v35_v21 = vld [vmem:[%s822_s0 + $0x30] sm:$0xff] }
   0xe   :  { %93 = vperm.xlu0 %513, %v59_v7   ;;  %78 = vperm.xlu2 %515, %v56_v20   ;;  %v236_v22 = vld [vmem:[%s826_s4 + $0x28] sm:$0xff]  ;;  %v55_v25 = vld [vmem:[%s824_s2 + $0x10] sm:$0xff]  ;;  %v33_v26 = vld [vmem:[%s822_s0 + $0x20] sm:$0xff] }
   0xf   :  { %v34_v23 = vld [vmem:[%s822_s0 + $0x28] sm:$0xff]  ;;  %v355_v27 = vld [vmem:[%s827_s5 + $0x10] sm:$0xff]  ;;  %v32_v28 = vld [vmem:[%s822_s0 + $0x18] sm:$0xff] }
  0x10   :  { %485 = vmatpush.xpose.msk.msra.mxu2 %vm101_vm0, %v41_v8  ;;  %486 = vmatpush.xpose.msk.msra.mxu3 %vm101_vm0, %v41_v8  ;;  %v354_v24 = vld [vmem:[%s827_s5 + $0x8] sm:$0xff]  ;;  %v237_v29 = vld [vmem:[%s826_s4 + $0x30] sm:$0xff]  ;;  %v231_v30 = vld [vmem:[%s826_s4] sm:$0xff] }
  0x11   :  { %450 = vmatpush.xpose.msk.msra.mxu0 %vm101_vm0, %v41_v8  ;;  %83 = vperm.xlu1 %514, %v57_v9   ;;  %v31_v31 = vld [vmem:[%s822_s0 + $0x10] sm:$0xff]  ;;  %v357_v32 = vld [vmem:[%s827_s5 + $0x20] sm:$0xff]  ;;  %v30_v33 = vld [vmem:[%s822_s0 + $0x8] sm:$0xff] }
  0x12   :  { %v234_v34 = vld [vmem:[%s826_s4 + $0x18] sm:$0xff]  ;;  %v358_v35 = vld [vmem:[%s827_s5 + $0x28] sm:$0xff]  ;;  %v29_v36 = vld [vmem:[%s822_s0] sm:$0xff] }
  0x13   :  { %v359_v37 = vld [vmem:[%s827_s5 + $0x30] sm:$0xff]  ;;  %v50_v39 = vld [vmem:[%s823_s1 + $0x28] sm:$0xff]  ;;  %v45_v40 = vld [vmem:[%s823_s1] sm:$0xff] }
  0x14   :  { %487 = vmatpush.xpose.msk.msra.mxu2 %vm101_vm0, %v40_v10  ;;  %488 = vmatpush.xpose.msk.msra.mxu3 %vm101_vm0, %v40_v10  ;;  %v47_v38 = vld [vmem:[%s823_s1 + $0x10] sm:$0xff]  ;;  %v353_v41 = vld [vmem:[%s827_s5] sm:$0xff]  ;;  %v48_v43 = vld [vmem:[%s823_s1 + $0x18] sm:$0xff] }
  0x15   :  { %451 = vmatpush.xpose.msk.msra.mxu0 %vm101_vm0, %v40_v10  ;;  %v361_v42 = vld [vmem:[#allocation2] sm:$0x1]  ;;  %v51_v44 = vld [vmem:[%s823_s1 + $0x30] sm:$0xff]  ;;  %v46_v45 = vld [vmem:[%s823_s1 + $0x8] sm:$0xff] }
  0x16   :  { %68 = vperm.xlu0 %513, %v54_v11   ;;  %73 = vperm.xlu2 %515, %v55_v25   ;;  %v356_v46 = vld [vmem:[%s827_s5 + $0x18] sm:$0xff]  ;;  %v49_v47 = vld [vmem:[%s823_s1 + $0x20] sm:$0xff]  ;;  %v224_v20 = vld [vmem:[%s825_s3 + $0x8] sm:$0xff] }
  0x17   :  { %v52_v48 = vld [vmem:[%s823_s1 + $0x38] sm:$0xff]  ;;  %v229_v25 = vld [vmem:[%s825_s3 + $0x30] sm:$0xff] }
  0x18   :  { %489 = vmatpush.xpose.msk.msra.mxu2 %vm101_vm0, %v39_v12  ;;  %490 = vmatpush.xpose.msk.msra.mxu3 %vm101_vm0, %v39_v12  ;;  %v238_v49 = vld [vmem:[%s826_s4 + $0x38] sm:$0xff] }
  0x19   :  { %452 = vmatpush.xpose.msk.msra.mxu0 %vm101_vm0, %v39_v12  ;;  %63 = vperm.xlu1 %514, %v53_v13   ;;  %v360_v50 = vld [vmem:[%s827_s5 + $0x38] sm:$0xff] }
  0x1c   :  { %491 = vmatpush.xpose.msk.msra.mxu2 %vm101_vm0, %v38_v14  ;;  %492 = vmatpush.xpose.msk.msra.mxu3 %vm101_vm0, %v38_v14 }
  0x1d   :  { %453 = vmatpush.xpose.msk.msra.mxu0 %vm101_vm0, %v38_v14 }
  0x1e   :  { %246 = vperm.xlu0 %513, %v232_v15   ;;  %241 = vperm.xlu2 %515, %v231_v30  }
  0x20   :  { %493 = vmatpush.xpose.msk.msra.mxu2 %vm101_vm0, %v37_v16  ;;  %494 = vmatpush.xpose.msk.msra.mxu3 %vm101_vm0, %v37_v16 }
  0x21   :  { %454 = vmatpush.xpose.msk.msra.mxu0 %vm101_vm0, %v37_v16  ;;  %251 = vperm.xlu1 %514, %v233_v17  }
  0x24   :  { %495 = vmatpush.xpose.msk.msra.mxu2 %vm101_vm0, %v36_v18  ;;  %496 = vmatpush.xpose.msk.msra.mxu3 %vm101_vm0, %v36_v18 }
  0x25   :  { %455 = vmatpush.xpose.msk.msra.mxu0 %vm101_vm0, %v36_v18 }
  0x26   :  { %261 = vperm.xlu0 %513, %v235_v19   ;;  %256 = vperm.xlu2 %515, %v234_v34   ;;  %v223_v19 = vld [vmem:[%s825_s3] sm:$0xff] }
  0x28   :  { %497 = vmatpush.xpose.msk.msra.mxu2 %vm101_vm0, %v35_v21  ;;  %498 = vmatpush.xpose.msk.msra.mxu3 %vm101_vm0, %v35_v21 }
  0x29   :  { %456 = vmatpush.xpose.msk.msra.mxu0 %vm101_vm0, %v35_v21  ;;  %266 = vperm.xlu1 %514, %v236_v22   ;;  %v225_v21 = vld [vmem:[%s825_s3 + $0x10] sm:$0xff]  ;;  %v226_v22 = vld [vmem:[%s825_s3 + $0x18] sm:$0xff] }
  0x2c   :  { %499 = vmatpush.xpose.msk.msra.mxu2 %vm101_vm0, %v34_v23  ;;  %500 = vmatpush.xpose.msk.msra.mxu3 %vm101_vm0, %v34_v23 }
  0x2d   :  { %457 = vmatpush.xpose.msk.msra.mxu0 %vm101_vm0, %v34_v23  ;;  %v227_v23 = vld [vmem:[%s825_s3 + $0x20] sm:$0xff] }
  0x2e   :  { %369 = vperm.xlu0 %513, %v354_v24   ;;  %364 = vperm.xlu2 %515, %v353_v41   ;;  %v228_v24 = vld [vmem:[%s825_s3 + $0x28] sm:$0xff] }
  0x30   :  { %501 = vmatpush.xpose.msk.msra.mxu2 %vm101_vm0, %v33_v26  ;;  %502 = vmatpush.xpose.msk.msra.mxu3 %vm101_vm0, %v33_v26 }
  0x31   :  { %458 = vmatpush.xpose.msk.msra.mxu0 %vm101_vm0, %v33_v26  ;;  %374 = vperm.xlu1 %514, %v355_v27   ;;  %v230_v26 = vld [vmem:[%s825_s3 + $0x38] sm:$0xff]  ;;  %s543_s3 = smov [#allocation3]  }
  0x32   :  { %s436_s10 = sshll.u32 %s543_s3, 4  ;;  %s437_s10 = int_to_ptr.vmem [resolvable:$true] %s436_s10 }
  0x34   :  { %503 = vmatpush.xpose.msk.msra.mxu2 %vm101_vm0, %v32_v28  ;;  %504 = vmatpush.xpose.msk.msra.mxu3 %vm101_vm0, %v32_v28 }
  0x35   :  { %459 = vmatpush.xpose.msk.msra.mxu0 %vm101_vm0, %v32_v28 }
  0x36   :  { %271 = vperm.xlu0 %513, %v237_v29   ;;  %379 = vperm.xlu2 %515, %v356_v46  }
  0x38   :  { %505 = vmatpush.xpose.msk.msra.mxu2 %vm101_vm0, %v31_v31  ;;  %506 = vmatpush.xpose.msk.msra.mxu3 %vm101_vm0, %v31_v31 }
  0x39   :  { %460 = vmatpush.xpose.msk.msra.mxu0 %vm101_vm0, %v31_v31  ;;  %384 = vperm.xlu1 %514, %v357_v32  }
  0x3c   :  { %507 = vmatpush.xpose.msk.msra.mxu2 %vm101_vm0, %v30_v33  ;;  %508 = vmatpush.xpose.msk.msra.mxu3 %vm101_vm0, %v30_v33 }
  0x3d   :  { %461 = vmatpush.xpose.msk.msra.mxu0 %vm101_vm0, %v30_v33 }
  0x3e   :  { %389 = vperm.xlu0 %513, %v358_v35   ;;  %276 = vperm.xlu2 %515, %v238_v49  }
  0x40   :  { %509 = vmatpush.xpose.msk.msra.mxu2 %vm101_vm0, %v29_v36  ;;  %510 = vmatpush.xpose.msk.msra.mxu3 %vm101_vm0, %v29_v36 }
  0x41   :  { %462 = vmatpush.xpose.msk.msra.mxu0 %vm101_vm0, %v29_v36  ;;  %394 = vperm.xlu1 %514, %v359_v37  }
  0x43   :  { %465 = vmatmul.msk.f32.vlgmr.msra.gmra.mxu2 %vm101_vm0, %v47_v38  ;;  %468 = vmatmul.msk.f32.vlgmr.msra.gmra.mxu3 %vm101_vm0, %v50_v39 }
  0x44   :  { %463 = vmatmul.msk.f32.vlgmr.msra.gmra.mxu0 %vm101_vm0, %v45_v40 }
  0x46   :  { %425 = vperm.xlu0 %513, %v361_v42   ;;  %399 = vperm.xlu2 %515, %v360_v50  }
  0x4b   :  { %466 = vmatmul.msk.f32.gmra.mxu2 %vm101_vm0, %v48_v43  ;;  %469 = vmatmul.msk.f32.gmra.mxu3 %vm101_vm0, %v51_v44 }
  0x4c   :  { %464 = vmatmul.msk.f32.gmra.mxu0 %vm101_vm0, %v46_v45 }
  0x53   :  { %467 = vmatmul.msk.f32.gmra.mxu2 %vm101_vm0, %v49_v47  ;;  %470 = vmatmul.msk.f32.gmra.mxu3 %vm101_vm0, %v52_v48 }
  0x68   :  { %v79_v57 = vpop.permute.xlu2 %78 }
  0x70   :  { %v74_v7 = vpop.permute.xlu2 %73 }
  0x78   :  { %v99_v53 = vpop.permute.xlu0 %98  ;;  %v242_v29 = vpop.permute.xlu2 %241 }
  0x7b   :  { %v89_v54 = vpop.permute.xlu1 %88 }
  0x80   :  { %v94_v59 = vpop.permute.xlu0 %93  ;;  %v257_v33 = vpop.permute.xlu2 %256 }
  0x83   :  { %v84_v63 = vpop.permute.xlu1 %83 }
  0x88   :  { %v69_v11 = vpop.permute.xlu0 %68  ;;  %v365_v37 = vpop.permute.xlu2 %364 }
  0x8b   :  { %v64_v14 = vpop.permute.xlu1 %63 }
  0x90   :  { %v247_v30 = vpop.permute.xlu0 %246  ;;  %v380_v42 = vpop.permute.xlu2 %379 }
  0x93   :  { %v252_v31 = vpop.permute.xlu1 %251 }
  0x98   :  { %v262_v34 = vpop.permute.xlu0 %261 }
  0x9b   :  { %v267_v36 = vpop.permute.xlu1 %266 }
  0xa0   :  { %v370_v39 = vpop.permute.xlu0 %369 }
  0xa3   :  { %v375_v40 = vpop.permute.xlu1 %374 }
  0xa8   :  { %v272_v48 = vpop.permute.xlu0 %271 }
  0xc1   :  { %v191_v58 = vpop.f32.mrf.mxu0 }
  0xc2   :  { %v192_v16 = vadd.f32 %v191_v58, %v64_v14 }
  0xc4   :  { %v215_v18 = vmax.f32 %v192_v16, 0.0 }
  0xc6   :  { %v197_v51 = vpop.f32.mrf.mxu2  ;;  %v206_v52 = vpop.f32.mrf.mxu3 }
  0xc7   :  { %v207_v1 = vadd.f32 %v206_v52, %v89_v54  ;;  %v198_v9 = vadd.f32 %v197_v51, %v74_v7  ;;  %v385_v52 = vpop.permute.xlu1 %384 }
  0xc9   :  { %v220_v5 = vmax.f32 %v207_v1, 0.0  ;;  %v194_v8 = vpop.f32.mrf.mxu0  ;;  %v217_v15 = vmax.f32 %v198_v9, 0.0 }
  0xca   :  { %v195_v13 = vadd.f32 %v194_v8, %v69_v11 }
  0xcc   :  { %v216_v17 = vmax.f32 %v195_v13, 0.0 }
  0xce   :  { %v200_v55 = vpop.f32.mrf.mxu2  ;;  %v209_v56 = vpop.f32.mrf.mxu3 }
  0xcf   :  { %v210_v61 = vadd.f32 %v209_v56, %v94_v59  ;;  %v201_v6 = vadd.f32 %v200_v55, %v79_v57  ;;  %v395_v7 = vpop.permute.xlu1 %394 }
  0xd1   :  { %v221_v3 = vmax.f32 %v210_v61, 0.0  ;;  %v218_v12 = vmax.f32 %v201_v6, 0.0  ;;  %v277_v61 = vpop.permute.xlu2 %276 }
  0xd6   :  { %v212_v60 = vpop.f32.mrf.mxu3  ;;  %v203_v0 = vpop.f32.mrf.mxu2 }
  0xd7   :  { %v213_v62 = vadd.f32 %v212_v60, %v99_v53  ;;  %v204_v4 = vadd.f32 %v203_v0, %v84_v63 }
  0xd9   :  { %v222_v2 = vmax.f32 %v213_v62, 0.0  ;;  %v219_v10 = vmax.f32 %v204_v4, 0.0  ;;  %v390_v4 = vpop.permute.xlu0 %389  ;;  %v400_v14 = vpop.permute.xlu2 %399 }
  0xdb   :  { %312 = vmatpush.msra.mxu1 %v222_v2 }
  0xdd   :  { %313 = vmatpush.msra.mxu1 %v221_v3 }
  0xdf   :  { %314 = vmatpush.msra.mxu1 %v220_v5 }
  0xe1   :  { %315 = vmatpush.msra.mxu1 %v219_v10 }
  0xe3   :  { %316 = vmatpush.msra.mxu1 %v218_v12 }
  0xe5   :  { %317 = vmatpush.msra.mxu1 %v217_v15 }
  0xe7   :  { %318 = vmatpush.msra.mxu1 %v216_v17 }
  0xe9   :  { %319 = vmatpush.msra.mxu1 %v215_v18 }
  0xea   :  { %471 = vmatmul.msk.f32.vlgmr.msra.gmra.mxu1 %vm279_vm1, %v223_v19 }
  0xf2   :  { %472 = vmatmul.msk.f32.gmra.mxu1 %vm279_vm1, %v224_v20 }
  0xfa   :  { %473 = vmatmul.msk.f32.gmra.mxu1 %vm279_vm1, %v225_v21 }
 0x102   :  { %474 = vmatmul.msk.f32.gmra.mxu1 %vm279_vm1, %v226_v22  ;;  %v426_v22 = vpop.permute.xlu0 %425 }
 0x10a   :  { %475 = vmatmul.msk.f32.gmra.mxu1 %vm279_vm1, %v227_v23 }
 0x112   :  { %476 = vmatmul.msk.f32.gmra.mxu1 %vm279_vm1, %v228_v24  ;;  %v428_v24 = vperm.slane %v426_v22, 0 }
 0x11a   :  { %477 = vmatmul.msk.f32.gmra.mxu1 %vm279_vm1, %v229_v25 }
 0x122   :  { %478 = vmatmul.msk.f32.gmra.mxu1 %vm279_vm1, %v230_v26 }
 0x167   :  { %v321_v27 = vpop.f32.mrf.mxu1 }
 0x168   :  { %v322_v44 = vadd.f32 %v321_v27, %v242_v29 }
 0x16a   :  { %v345_v49 = vmax.f32 %v322_v44, 0.0 }
 0x16c   :  { %v402_v57 = vmul.f32 %v365_v37, %v345_v49 }
 0x16f   :  { %v324_v28 = vpop.f32.mrf.mxu1 }
 0x170   :  { %v325_v41 = vadd.f32 %v324_v28, %v247_v30 }
 0x172   :  { %v346_v46 = vmax.f32 %v325_v41, 0.0 }
 0x174   :  { %v403_v53 = vmul.f32 %v370_v39, %v346_v46 }
 0x176   :  { %v410_v62 = vadd.f32 %v403_v53, %v402_v57 }
 0x177   :  { %v327_v32 = vpop.f32.mrf.mxu1 }
 0x178   :  { %v328_v45 = vadd.f32 %v327_v32, %v252_v31 }
 0x17a   :  { %v347_v50 = vmax.f32 %v328_v45, 0.0 }
 0x17c   :  { %v404_v58 = vmul.f32 %v375_v40, %v347_v50 }
 0x17e   :  { %v411_v1 = vadd.f32 %v410_v62, %v404_v58 }
 0x17f   :  { %v330_v35 = vpop.f32.mrf.mxu1 }
 0x180   :  { %v331_v47 = vadd.f32 %v330_v35, %v257_v33 }
 0x182   :  { %v348_v54 = vmax.f32 %v331_v47, 0.0 }
 0x184   :  { %v405_v63 = vmul.f32 %v380_v42, %v348_v54 }
 0x186   :  { %v412_v5 = vadd.f32 %v411_v1, %v405_v63 }
 0x187   :  { %v333_v38 = vpop.f32.mrf.mxu1 }
 0x188   :  { %v334_v51 = vadd.f32 %v333_v38, %v262_v34 }
 0x18a   :  { %v349_v59 = vmax.f32 %v334_v51, 0.0 }
 0x18c   :  { %v406_v2 = vmul.f32 %v385_v52, %v349_v59 }
 0x18e   :  { %v413_v9 = vadd.f32 %v412_v5, %v406_v2 }
 0x18f   :  { %v336_v43 = vpop.f32.mrf.mxu1 }
 0x190   :  { %v337_v55 = vadd.f32 %v336_v43, %v267_v36 }
 0x192   :  { %v350_v0 = vmax.f32 %v337_v55, 0.0 }
 0x194   :  { %v407_v6 = vmul.f32 %v390_v4, %v350_v0 }
 0x196   :  { %v414_v12 = vadd.f32 %v413_v9, %v407_v6 }
 0x197   :  { %v339_v56 = vpop.f32.mrf.mxu1 }
 0x198   :  { %v340_v60 = vadd.f32 %v339_v56, %v272_v48 }
 0x19a   :  { %v351_v3 = vmax.f32 %v340_v60, 0.0 }
 0x19c   :  { %v408_v10 = vmul.f32 %v395_v7, %v351_v3 }
 0x19e   :  { %v415_v15 = vadd.f32 %v414_v12, %v408_v10 }
 0x19f   :  { %v342_v8 = vpop.f32.mrf.mxu1 }
 0x1a0   :  { %v343_v11 = vadd.f32 %v342_v8, %v277_v61 }
 0x1a2   :  { %v352_v13 = vmax.f32 %v343_v11, 0.0 }
 0x1a4   :  { %v409_v16 = vmul.f32 %v400_v14, %v352_v13 }
 0x1a6   :  { %v416_v17 = vadd.f32 %v415_v15, %v409_v16 }
 0x1a8   :  { %v417_v18 = vrot.slane %v416_v17, 4 }
 0x1aa   :  { %v418_v19 = vadd.f32 %v417_v18, %v416_v17 }
 0x1ac   :  { %v419_v20 = vrot.slane %v418_v19, 2 }
 0x1ae   :  { %v420_v21 = vadd.f32 %v419_v20, %v418_v19 }
 0x1b0   :  { %v421_v23 = vrot.slane %v420_v21, 1 }
 0x1b2   :  { %v422_v25 = vadd.f32 %v421_v23, %v420_v21 }
 0x1b4   :  { %v429_v26 = vadd.f32 %v428_v24, %v422_v25 }
 0x1b6   :  { %430 = vst [vmem:[#allocation3] sm:$0x1] %v429_v26 }
 0x1b7   :  { %441 = dma.vmem_to_hbm [thread:$0]  %s437_s10, 16, %s439_s13, [#allocation4]  }
 0x1b8   :  { %540 = dma.done.wait [#allocation4], 16  }
 0x1b9   :  { %541 = vsyncadd [#allocation4], 4294967280 }
 0x1ba   :  { %446 = vsyncpa [#allocation4], 1 }

</bundles_post_ra>
